<compile_context>
chip_gen: v6e
topology: v6e:2x2x1
jax: 0.10.0
libtpu: 0.0.40
codegen_flags: <defaults>
</compile_context>

<pallas_src>
import jax
import jax.numpy as jnp
from jax.experimental import pallas as pl
from jax.experimental.pallas import tpu as pltpu


# ----------------------------------------------------------------------------- kernel
def _se_apply_kernel(x_ref, gate_ref, wsp_ref, out_ref):
    # x_ref:    (1, C, T)   input tile (spatial tile of H*W on the lane axis)
    # gate_ref: (1, C, 1)   per-(batch, channel) channel-SE gate, f32 (precomputed)
    # wsp_ref:  (C, 1)      spatial-SE 1x1 conv weight as a column, f32
    # out_ref:  (1, 2C, T)  concat([channel_SE, spatial_SE]) along channels
    C = x_ref.shape[1]
    x = x_ref[0].astype(jnp.float32)                                   # (C, T)

    # channel SE: broadcast the per-channel gate over the lane (spatial) axis
    out_ref[0, :C, :] = (x * gate_ref[0]).astype(out_ref.dtype)

    # spatial SE: sublane reduce over channels (VPU/XLU, no MXU), then sigmoid
    spa_logits = jnp.sum(wsp_ref[...] * x, axis=0, keepdims=True)      # (1, T)
    spa_gate = jax.nn.sigmoid(spa_logits)                              # (1, T)
    out_ref[0, C:, :] = (x * spa_gate).astype(out_ref.dtype)


# ----------------------------------------------------------------------------- wrapper
def _choose_tile(hw_pad, c, itemsize, max_lanes=2048,
                 vmem_tile_budget=24 * 1024 * 1024):
    """Largest multiple-of-128 divisor of hw_pad whose double-buffered
    (x tile + out tile) footprint stays under the budget."""
    # per grid step ~ 2 * (C*T + 2C*T) * itemsize = 6*C*T*itemsize
    t = vmem_tile_budget // (6 * c * itemsize)
    t = max(128, (t // 128) * 128)
    t = min(t, max_lanes, hw_pad)
    while hw_pad % t != 0:            # hw_pad is a multiple of 128 -> terminates
        t -= 128
    return t


def scse_forward(x, params, mode="concat"):
    """x: (B, C, H, W); params: dict of fc1/fc2/spatial_se weights (f32)."""
    assert mode == "concat", "only 'concat' mode implemented here"
    B, C, H, W = x.shape
    HW = H * W
    HW_pad = ((HW + 127) // 128) * 128
    itemsize = jnp.dtype(x.dtype).itemsize

    # ---- channel-SE gate, hoisted to plain JAX (tiny), accumulated in f32 ----
    xf = x.astype(jnp.float32)
    pooled = jnp.mean(xf, axis=(2, 3))                                   # (B, C)
    h = jnp.maximum(pooled @ params["w1"].T + params["b1"], 0.0)         # (B, Cr)
    gate = jax.nn.sigmoid(h @ params["w2"].T + params["b2"])             # (B, C)
    gate = gate.reshape(B, C, 1).astype(jnp.float32)

    wsp_col = params["wsp"].reshape(C, 1).astype(jnp.float32)            # (C, 1)

    # ---- lane-dense layout: spatial axis last, padded to a multiple of 128 ----
    x_flat = x.reshape(B, C, HW)
    if HW_pad != HW:
        x_flat = jnp.pad(x_flat, ((0, 0), (0, 0), (0, HW_pad - HW)))

    t_hw = _choose_tile(HW_pad, C, itemsize)
    grid = (B, HW_pad // t_hw)

    cost = pl.CostEstimate(
        flops=4 * B * C * HW_pad,
        transcendentals=B * HW_pad,
        bytes_accessed=3 * B * C * HW_pad * itemsize,   # read x, write 2C*HW
    )

    out = pl.pallas_call(
        _se_apply_kernel,
        out_shape=jax.ShapeDtypeStruct((B, 2 * C, HW_pad), x.dtype),
        grid_spec=pltpu.PrefetchScalarGridSpec(
            num_scalar_prefetch=0,
            grid=grid,
            in_specs=[
                pl.BlockSpec((1, C, t_hw), lambda b, t: (b, 0, t)),
                pl.BlockSpec((1, C, 1), lambda b, t: (b, 0, 0)),
                pl.BlockSpec((C, 1), lambda b, t: (0, 0)),
            ],
            out_specs=pl.BlockSpec((1, 2 * C, t_hw), lambda b, t: (b, 0, t)),
        ),
        compiler_params=pltpu.CompilerParams(
            dimension_semantics=("parallel", "parallel"),
            vmem_limit_bytes=48 * 1024 * 1024,
        ),
        cost_estimate=cost,
    )(x_flat, gate, wsp_col)

    return out[:, :, :HW].reshape(B, 2 * C, H, W)


# ----------------------------------------------------------------------------- reference
def scse_reference(x, params):
    """Pure-JAX reference of the PyTorch forward (NCHW, 1x1 convs as matmuls)."""
    xf = x.astype(jnp.float32)
    pooled = jnp.mean(xf, axis=(2, 3))                                   # (B, C)
    h = jnp.maximum(pooled @ params["w1"].T + params["b1"], 0.0)         # (B, Cr)
    s = jax.nn.sigmoid(h @ params["w2"].T + params["b2"])                # (B, C)
    chn_se = xf * s[:, :, None, None]
    spa = jax.nn.sigmoid(jnp.einsum("oc,bchw->bohw", params["wsp"], xf)) # (B,1,H,W)
    spa_se = xf * spa
    return jnp.concatenate([chn_se, spa_se], axis=1)


def init_params(key, channels, reduction=16):
    cr = max(1, channels // reduction)
    k1, k2, k3, k4, k5 = jax.random.split(key, 5)
    scale1 = 1.0 / jnp.sqrt(channels)
    scale2 = 1.0 / jnp.sqrt(cr)
    return {
        "w1": jax.random.uniform(k1, (cr, channels), jnp.float32, -scale1, scale1),
        "b1": jax.random.uniform(k2, (cr,), jnp.float32, -scale1, scale1),
        "w2": jax.random.uniform(k3, (channels, cr), jnp.float32, -scale2, scale2),
        "b2": jax.random.uniform(k4, (channels,), jnp.float32, -scale2, scale2),
        "wsp": jax.random.uniform(k5, (1, channels), jnp.float32, -scale1, scale1),
    }


# ----------------------------------------------------------------------------- main
if __name__ == "__main__":
    key = jax.random.PRNGKey(0)
    kx1, kx2, kp1, kp2 = jax.random.split(key, 4)

    # --- case 1: f32, HW already a multiple of 128 ---
    B, C, H, W = 2, 32, 16, 16
    x1 = jax.random.normal(kx1, (B, C, H, W), dtype=jnp.float32)
    p1 = init_params(kp1, C, reduction=16)
    out1 = jax.block_until_ready(scse_forward(x1, p1))
    ref1 = scse_reference(x1, p1)
    assert out1.shape == (B, 2 * C, H, W)
    assert jnp.allclose(out1, ref1, atol=1e-5, rtol=1e-5), "f32 mismatch (case 1)"

    # --- case 2: f32, HW not a multiple of 128 (exercises lane padding path) ---
    B2, C2, H2, W2 = 2, 64, 14, 14
    x2 = jax.random.normal(kx2, (B2, C2, H2, W2), dtype=jnp.float32)
    p2 = init_params(kp2, C2, reduction=16)
    out2 = jax.block_until_ready(scse_forward(x2, p2))
    ref2 = scse_reference(x2, p2)
    assert out2.shape == (B2, 2 * C2, H2, W2)
    assert jnp.allclose(out2, ref2, atol=1e-5, rtol=1e-5), "f32 mismatch (case 2)"

    # --- case 3: bf16 I/O (halves HBM traffic), math still f32 in-kernel ---
    x3 = x1.astype(jnp.bfloat16)
    out3 = jax.block_until_ready(scse_forward(x3, p1))
    ref3 = scse_reference(x3, p1)                       # f32 ref on the bf16 inputs
    assert out3.dtype == jnp.bfloat16
    assert jnp.allclose(out3.astype(jnp.float32), ref3, atol=3e-2), "bf16 mismatch"

    print("KERNEL_OK")
</pallas_src>

<mosaic_0001>
module attributes {stable_mosaic.version = 11 : i64} {
  func.func @_se_apply_kernel(%arg0: i32, %arg1: i32, %arg2: memref<1x32x256xf32, #tpu.memory_space<vmem>>, %arg3: memref<1x32x1xf32, #tpu.memory_space<vmem>>, %arg4: memref<32x1xf32, #tpu.memory_space<vmem>>, %arg5: memref<1x64x256xf32, #tpu.memory_space<vmem>>) attributes {dimension_semantics = [#tpu.dimension_semantics<parallel>, #tpu.dimension_semantics<parallel>], iteration_bounds = array<i64: 2, 1>, scalar_prefetch = 0 : i64, scratch_operands = 0 : i64, tpu.core_type = #tpu.core_type<tc>, window_params = [{transform_indices = @transform_0, window_bounds = array<i64: 1, 32, 256>}, {transform_indices = @transform_1, window_bounds = array<i64: 1, 32, 1>}, {pipeline_mode = #tpu.pipeline_mode<synchronous>, transform_indices = @transform_2, window_bounds = array<i64: 32, 1>}, {transform_indices = @transform_3, window_bounds = array<i64: 1, 64, 256>}]} {
    %c0 = arith.constant 0 : index
    %c0_0 = arith.constant 0 : index
    %c0_1 = arith.constant 0 : index
    %0 = vector.load %arg2[%c0, %c0_0, %c0_1] : memref<1x32x256xf32, #tpu.memory_space<vmem>>, vector<1x32x256xf32>
    %1 = vector.shape_cast %0 : vector<1x32x256xf32> to vector<32x256xf32>
    %c0_2 = arith.constant 0 : index
    %c0_3 = arith.constant 0 : index
    %c0_4 = arith.constant 0 : index
    %2 = vector.load %arg3[%c0_2, %c0_3, %c0_4] : memref<1x32x1xf32, #tpu.memory_space<vmem>>, vector<1x32x1xf32>
    %3 = vector.shape_cast %2 : vector<1x32x1xf32> to vector<32x1xf32>
    %4 = vector.broadcast %3 : vector<32x1xf32> to vector<32x256xf32>
    %5 = arith.mulf %1, %4 : vector<32x256xf32>
    %c0_5 = arith.constant 0 : index
    %c0_6 = arith.constant 0 : index
    %c0_7 = arith.constant 0 : index
    %6 = vector.load %arg5[%c0_5, %c0_6, %c0_7] : memref<1x64x256xf32, #tpu.memory_space<vmem>>, vector<1x32x256xf32>
    %7 = vector.shape_cast %6 : vector<1x32x256xf32> to vector<32x256xf32>
    %8 = vector.shape_cast %5 : vector<32x256xf32> to vector<1x32x256xf32>
    tpu.vector_store %arg5[%c0_5, %c0_6, %c0_7], %8 {strides = array<i32>} : memref<1x64x256xf32, #tpu.memory_space<vmem>>, vector<1x32x256xf32>,
    %c0_8 = arith.constant 0 : index
    %c0_9 = arith.constant 0 : index
    %9 = vector.load %arg4[%c0_8, %c0_9] : memref<32x1xf32, #tpu.memory_space<vmem>>, vector<32x1xf32>
    %10 = vector.broadcast %9 : vector<32x1xf32> to vector<32x256xf32>
    %11 = arith.mulf %10, %1 : vector<32x256xf32>
    %cst = arith.constant dense<0.000000e+00> : vector<256xf32>
    %12 = vector.multi_reduction <add>, %11, %cst [0] : vector<32x256xf32> to vector<256xf32>
    %13 = vector.shape_cast %12 : vector<256xf32> to vector<1x256xf32>
    %14 = arith.negf %13 : vector<1x256xf32>
    %15 = math.exp %14 : vector<1x256xf32>
    %cst_10 = arith.constant 1.000000e+00 : f32
    %16 = vector.broadcast %cst_10 : f32 to vector<1x256xf32>
    %17 = arith.addf %16, %15 : vector<1x256xf32>
    %18 = arith.divf %16, %17 : vector<1x256xf32>
    %19 = vector.broadcast %18 : vector<1x256xf32> to vector<32x256xf32>
    %20 = arith.mulf %1, %19 : vector<32x256xf32>
    %c0_11 = arith.constant 0 : index
    %c32 = arith.constant 32 : index
    %c0_12 = arith.constant 0 : index
    %21 = vector.load %arg5[%c0_11, %c32, %c0_12] : memref<1x64x256xf32, #tpu.memory_space<vmem>>, vector<1x32x256xf32>
    %22 = vector.shape_cast %21 : vector<1x32x256xf32> to vector<32x256xf32>
    %23 = vector.shape_cast %20 : vector<32x256xf32> to vector<1x32x256xf32>
    tpu.vector_store %arg5[%c0_11, %c32, %c0_12], %23 {strides = array<i32>} : memref<1x64x256xf32, #tpu.memory_space<vmem>>, vector<1x32x256xf32>,
    return
  }
  func.func @transform_0(%arg0: i32, %arg1: i32) -> (i32, i32, i32) {
    %c0_i32 = arith.constant 0 : i32
    %c0_i32_0 = arith.constant 0 : i32
    return %arg0, %c0_i32, %arg1 : i32, i32, i32
  }
  func.func @transform_1(%arg0: i32, %arg1: i32) -> (i32, i32, i32) {
    %c0_i32 = arith.constant 0 : i32
    %c0_i32_0 = arith.constant 0 : i32
    %c0_i32_1 = arith.constant 0 : i32
    return %arg0, %c0_i32, %c0_i32_0 : i32, i32, i32
  }
  func.func @transform_2(%arg0: i32, %arg1: i32) -> (i32, i32) {
    %c0_i32 = arith.constant 0 : i32
    %c0_i32_0 = arith.constant 0 : i32
    %c0_i32_1 = arith.constant 0 : i32
    return %c0_i32, %c0_i32_0 : i32, i32
  }
  func.func @transform_3(%arg0: i32, %arg1: i32) -> (i32, i32, i32) {
    %c0_i32 = arith.constant 0 : i32
    %c0_i32_0 = arith.constant 0 : i32
    return %arg0, %c0_i32, %arg1 : i32, i32, i32
  }
}

</mosaic_0001>

<bundles_post_ra>
// kernel: tpu_custom_call.1
= control target key start
LH: loop header
LB: loop body
LE: loop exit
PB: predicated region body
PF: predicated region fallthrough
CT: control target
= control target key end

     0   :  { %8 = vsyncpa [#allocation3], 0  ;;  %s939_s0 = inlined_call_operand.hbm [shape: f32[2,32,256], index: 0, kind: input, shape index: {}]   ;;  %s940_s1 = inlined_call_operand.vmem [shape: f32[2,32,1], index: 1, kind: input, shape index: {}]   ;;  %s941_s2 = inlined_call_operand.vmem [shape: f32[32,1], index: 2, kind: input, shape index: {}]   ;;  %s942_s3 = inlined_call_operand.hbm [shape: f32[2,64,256], index: 3, kind: output, shape index: {}]  }
   0x1   :  { %10 = vsyncpa [#allocation3 + $0x1], 0 }
   0x2   :  { %11 = vsyncpa [#allocation4], 0 }
   0x3   :  { %13 = vsyncpa [#allocation4 + $0x1], 0  ;;  %s706_s12 = smov 0   ;;  %s708_s13 = smov 0  }
   0x4   :  { %s710_s14 = smov 0   ;;  %s712_s15 = smov 0  }
   0x5   :  { %s714_s16 = smov 0   ;;  %s716_s17 = smov 0  }
   0x6 LB: > { %s470_s18 = sadd.s32 4294967295, %s677_s17   ;;  %s471_s19 = sadd.s32 4294967294, %s677_s17   ;;  %s677_s17 = sphi %s716_s17, %s19_s17   ;;  %s673_s16 = sphi %s714_s16, %s953_s16   ;;  %s669_s15 = sphi %s712_s15, %s952_s15   ;;  %s665_s14 = sphi %s710_s14, %s951_s14   ;;  %s661_s13 = sphi %s708_s13, %s950_s13   ;;  %s657_s12 = sphi %s706_s12, %s949_s12  }
   0x7   : > { %s31_s20 = sadd.s32 1, %s673_s16  ;;  %s40_s21 = sadd.s32 1, %s665_s14 }
   0x8   : > { %p33_p0 = scmp.ge.s32.totalorder %s31_s20, 2  ;;  %p47_p1 = scmp.ne.s32.totalorder %s665_s14, %s661_s13 }
   0x9   : > { %p48_p2 = scmp.eq.s32.totalorder %s677_s17, 0  ;;  %p53_p3 = scmp.ne.s32.totalorder %s661_s13, %s657_s12 }
   0xa   : > { %s955_s20 = smov (%p33_p0, %s31_s20), 0  ;;  %p54_p5 = scmp.eq.s32.totalorder %s470_s18, 0 }
   0xb   : > { %p747_p4 = por %p48_p2, %p47_p1  ;;  %s35_s23 = ssub.s32 %s673_s16, %s955_s20 }
   0xc   : > { %p126_p6 = scmp.eq.s32.totalorder %s470_s18, 1  ;;  %p38_p7 = scmp.eq.s32.totalorder %s35_s23, 0 }
   0xd   : > { %p753_p8 = por %p54_p5, %p53_p3  ;;  %p132_p10 = scmp.eq.s32.totalorder %s471_s19, 1 }
   0xe   : > { %p757_p9 = por %p126_p6, %p47_p1  ;;  %p504_p13 = scmp.lt.s32.totalorder %s677_s17, 2 }
   0xf   : > { %s762_s26 = scalar_select %p38_p7, %s665_s14, %s40_s21  }
  0x10   : > { %p764_p11 = por %p132_p10, %p53_p3  ;;  %s155_s28 = sand.u32 1, %s665_s14  }
  0x11   : > { %s474_s29 = sshll.u32 %s155_s28, 6  ;;  %s489_s30 = sshll.u32 %s673_s16, 10 }
  0x12   : > { %s167_s6 = scalar_lea.hbm %s939_s0, %s489_s30  ;;  %s159_s7 = scalar_lea.vmem [#allocation2], %s474_s29 }
  0x13   : > { %s168_s8 = sshll.u32 %s159_s7, 4  ;;  %p777_p0 = pnand %p504_p13, %p747_p4  ;;  %s169_s8 = int_to_ptr.vmem [resolvable:$true] %s168_s8 }
  0x14   : > { %p477_p1 = scmp.ge.s32.totalorder %s677_s17, 1  ;;  %s156_s10 = scalar_lea.sflag [#allocation3], %s155_s28 }
  0x15   : > { %p571_p2 = pneg %p777_p0  ;;  %s582_s11 = scalar_lea.vmem %s169_s8, 1024 }
  0x16   : > { %p583_p3 = scmp.ne.s32.totalorder %s169_s8, %s582_s11  ;;  %s679_s18 = smov [#allocation2]  }
  0x17   : > { %s587_s19 = sshll.u32 %s679_s18, 4  ;;  %s588_s19 = int_to_ptr.vmem [resolvable:$false] %s587_s19 }
  0x18   : > { %p585_p5 = pnand %p583_p3, %p571_p2  ;;  %s589_s21 = scalar_lea.vmem %s588_s19, 2048 }
  0x19   : > { %p590_p7 = scmp.lt.s32.totalorder %s169_s8, %s588_s19  ;;  %p591_p10 = scmp.lt.s32.totalorder %s589_s21, %s582_s11 }
  0x1a   : > { %p586_p6 = pneg %p585_p5 }
  0x1b   : > { %p592_p12 = por %p591_p10, %p590_p7 }
  0x1d   : > { %p593_p4 = pnand %p592_p12, %p586_p6 }
  0x1f   : > { %596 = shalt.err (!%p593_p4)
}
  0x20   : > { %s680_s22 = smov 256   ;;  %s681_s23 = smov 16  }
  0x21   : > { %499 = dma.hbm_to_vmem [thread:$0]  (!%p777_p0), %s167_s6, 1024, %s169_s8, %s156_s10, %s680_s22, %s680_s22, %s681_s23  }
  0x22   : > { %p184_p13 = scmp.lt.s32.totalorder %s677_s17, 3 }
  0x24   : > { %p185_p2 = pnand %p477_p1, %p184_p13 }
  0x25   : > { %s790_s28 = sand.u32 (!%p185_p2), 1, %s661_s13  }
  0x26   : > { %188 = sbr.rel (%p185_p2) target bundleno = 245 (0xf5), region = 32  ;;  %s478_s29 = sshll.u32 (!%p185_p2), %s790_s28, 6 }
  0x27   : > { %s191_s30 = scalar_lea.sflag (!%p185_p2), [#allocation3], %s790_s28  ;;  %s794_s4 = scalar_lea.vmem (!%p185_p2), [#allocation2], %s478_s29 }
  0x2b   : > { %648 = dma.done.wait (%p753_p8), %s191_s30, 1024  }
  0x2c   : > { %650 = vsyncadd (%p753_p8), %s191_s30, 4294966272  ;;  %p223_p12 = scmp.lt.s32.totalorder %s669_s15, 1  ;;  %v682_v0 = vmov 0   ;;  %v279_v1 = vld [vmem:[%s941_s2 + $0x10] sm:$0xff]  ;;  %v277_v2 = vld [vmem:[%s941_s2] sm:$0xff]  ;;  %s479_s29 = sshll.u32 %s790_s28, 7 }
  0x2d   : > { %560 = vset.pattern.permute.xlu1 %v682_v0  ;;  %559 = vset.pattern.permute.xlu0 %v682_v0  ;;  %v280_v3 = vld [vmem:[%s941_s2 + $0x18] sm:$0xff]  ;;  %v278_v4 = vld [vmem:[%s941_s2 + $0x8] sm:$0xff]  ;;  %v818_v11 = vld [vmem:[%s794_s4] sm:$0xff]  ;;  %s854_s30 = scalar_lea.vmem [#allocation5], %s479_s29  ;;  %s356_s8 = scalar_lea.sflag [#allocation4], %s790_s28 }
  0x2e   : > { %s224_s5 = scalar_select %p223_p12, %s669_s15, 1  ;;  %293 = vperm.xlu1 %560, %v279_v1   ;;  %283 = vperm.xlu0 %559, %v277_v2   ;;  %v821_v12 = vld [vmem:[%s794_s4 + $0x8] sm:$0xff]  ;;  %v824_v13 = vld [vmem:[%s794_s4 + $0x10] sm:$0xff]  ;;  %v827_v14 = vld [vmem:[%s794_s4 + $0x18] sm:$0xff] }
  0x2f   : > { %v830_v15 = vld [vmem:[%s794_s4 + $0x20] sm:$0xff]  ;;  %v833_v16 = vld [vmem:[%s794_s4 + $0x28] sm:$0xff]  ;;  %v838_v21 = vld [vmem:[%s794_s4 + $0x30] sm:$0xff] }
  0x30   : > { %s490_s10 = sshll.u32 %s224_s5, 5  ;;  %v841_v22 = vld [vmem:[%s794_s4 + $0x38] sm:$0xff]  ;;  %s491_s4 = sshll.u32 %s669_s15, 11 }
  0x31   : > { %s227_s23 = scalar_lea.vmem %s940_s1, %s490_s10  ;;  %s371_s5 = sshll.u32 %s854_s30, 4  ;;  %s879_s5 = int_to_ptr.vmem [resolvable:$true] %s371_s5 }
  0x32   : > { %298 = vperm.xlu1 %560, %v280_v3   ;;  %288 = vperm.xlu0 %559, %v278_v4   ;;  %v238_v5 = vld [vmem:[%s227_s23 + $0x8] sm:$0xff]  ;;  %v237_v6 = vld [vmem:[%s227_s23] sm:$0xff]  ;;  %v240_v7 = vld [vmem:[%s227_s23 + $0x18] sm:$0xff]  ;;  %s877_s7 = scalar_lea.hbm %s942_s3, %s491_s4  ;;  %s597_s9 = scalar_lea.vmem %s879_s5, 2048 }
  0x33   : > { %v239_v8 = vld [vmem:[%s227_s23 + $0x10] sm:$0xff]  ;;  %p598_p8 = scmp.ne.s32.totalorder %s879_s5, %s597_s9  ;;  %s683_s10 = smov [#allocation5]  }
  0x34   : > { %s601_s24 = sshll.u32 %s683_s10, 4  ;;  %s602_s24 = int_to_ptr.vmem [resolvable:$false] %s601_s24 }
  0x35   : > { %p599_p0 = pnand %p598_p8, %p757_p9  ;;  %s603_s11 = scalar_lea.vmem %s602_s24, 4096 }
  0x36   : > { %248 = vperm.xlu1 %560, %v238_v5   ;;  %243 = vperm.xlu0 %559, %v237_v6   ;;  %p604_p3 = scmp.lt.s32.totalorder %s879_s5, %s602_s24  ;;  %p605_p5 = scmp.lt.s32.totalorder %s603_s11, %s597_s9 }
  0x37   : > { %p600_p1 = pneg %p599_p0 }
  0x38   : > { %p606_p6 = por %p605_p5, %p604_p3 }
  0x3a   : > { %258 = vperm.xlu1 %560, %v240_v7   ;;  %253 = vperm.xlu0 %559, %v239_v8   ;;  %p607_p7 = pnand %p606_p6, %p600_p1 }
  0xa9   : > { %v294_v9 = vpop.permute.xlu1 %293  ;;  %v284_v10 = vpop.permute.xlu0 %283 }
  0xaa   : > { %v301_v19 = vmul.f32 %v284_v10, %v818_v11  ;;  %v302_v20 = vmul.f32 %v284_v10, %v821_v12  ;;  %v305_v25 = vmul.f32 %v294_v9, %v830_v15  ;;  %v306_v26 = vmul.f32 %v294_v9, %v833_v16 }
  0xad   : > { %v299_v17 = vpop.permute.xlu1 %298  ;;  %v289_v18 = vpop.permute.xlu0 %288 }
  0xae   : > { %v303_v23 = vmul.f32 %v289_v18, %v824_v13  ;;  %v304_v24 = vmul.f32 %v289_v18, %v827_v14  ;;  %v307_v29 = vmul.f32 %v299_v17, %v838_v21  ;;  %v308_v30 = vmul.f32 %v299_v17, %v841_v22 }
  0xb0   : > { %v309_v27 = vadd.f32 %v303_v23, %v301_v19  ;;  %v318_v28 = vadd.f32 %v304_v24, %v302_v20 }
  0xb1   : > { %v249_v31 = vpop.permute.xlu1 %248  ;;  %v244_v32 = vpop.permute.xlu0 %243 }
  0xb2   : > { %v310_v33 = vadd.f32 %v309_v27, %v305_v25  ;;  %v319_v34 = vadd.f32 %v318_v28, %v306_v26  ;;  %v263_v35 = vmul.f32 %v249_v31, %v824_v13  ;;  %v264_v36 = vmul.f32 %v249_v31, %v827_v14 }
  0xb3   : > { %v261_v37 = vmul.f32 %v244_v32, %v818_v11  ;;  %v262_v38 = vmul.f32 %v244_v32, %v821_v12 }
  0xb4   : > { %v311_v39 = vadd.f32 %v310_v33, %v307_v29  ;;  %v320_v40 = vadd.f32 %v319_v34, %v308_v30  ;;  %271 = vst [vmem:[%s854_s30 + $0x10] sm:$0xff] %v263_v35  ;;  %272 = vst [vmem:[%s854_s30 + $0x18] sm:$0xff] %v264_v36 }
  0xb5   : > { %269 = vst [vmem:[%s854_s30] sm:$0xff] %v261_v37  ;;  %270 = vst [vmem:[%s854_s30 + $0x8] sm:$0xff] %v262_v38  ;;  %v259_v41 = vpop.permute.xlu1 %258  ;;  %v254_v42 = vpop.permute.xlu0 %253 }
  0xb6   : > { %v312_v43 = vrot.slane %v311_v39, 4  ;;  %v321_v44 = vrot.slane %v320_v40, 4  ;;  %v267_v45 = vmul.f32 %v259_v41, %v838_v21  ;;  %v268_v46 = vmul.f32 %v259_v41, %v841_v22 }
  0xb7   : > { %v265_v47 = vmul.f32 %v254_v42, %v830_v15  ;;  %v266_v48 = vmul.f32 %v254_v42, %v833_v16 }
  0xb8   : > { %v313_v49 = vadd.f32 %v312_v43, %v311_v39  ;;  %v322_v50 = vadd.f32 %v321_v44, %v320_v40  ;;  %275 = vst [vmem:[%s854_s30 + $0x30] sm:$0xff] %v267_v45  ;;  %276 = vst [vmem:[%s854_s30 + $0x38] sm:$0xff] %v268_v46 }
  0xb9   : > { %273 = vst [vmem:[%s854_s30 + $0x20] sm:$0xff] %v265_v47  ;;  %274 = vst [vmem:[%s854_s30 + $0x28] sm:$0xff] %v266_v48 }
  0xba   : > { %v314_v51 = vrot.slane %v313_v49, 2  ;;  %v323_v52 = vrot.slane %v322_v50, 2 }
  0xbc   : > { %v315_v53 = vadd.f32 %v314_v51, %v313_v49  ;;  %v324_v54 = vadd.f32 %v323_v52, %v322_v50 }
  0xbe   : > { %v316_v55 = vrot.slane %v315_v53, 1  ;;  %v325_v56 = vrot.slane %v324_v54, 1 }
  0xc0   : > { %v317_v57 = vadd.f32 %v316_v55, %v315_v53  ;;  %v326_v58 = vadd.f32 %v325_v56, %v324_v54 }
  0xc2   : > { %v482_v59 = vmul.f32 -1.442695, %v317_v57  ;;  %v483_v60 = vmul.f32 -1.442695, %v326_v58 }
  0xc4   : > { %561 = vpow2.f32 %v482_v59 }
  0xc5   : > { %563 = vpow2.f32 %v483_v60 }
  0xd1   : > { %v562_v61 = vpop.eup %561 }
  0xd2   : > { %v564_v62 = vpop.eup %563  ;;  %v333_v63 = vadd.f32 1.0, %v562_v61 }
  0xd3   : > { %v334_v0 = vadd.f32 1.0, %v564_v62 }
  0xd4   : > { %565 = vrcp.f32 %v333_v63 }
  0xd5   : > { %567 = vrcp.f32 %v334_v0 }
  0xe1   : > { %v566_v1 = vpop.eup %565 }
  0xe2   : > { %v568_v2 = vpop.eup %567  ;;  %v339_v3 = vmul.f32 %v566_v1, %v818_v11  ;;  %v341_v4 = vmul.f32 %v566_v1, %v824_v13  ;;  %v343_v5 = vmul.f32 %v566_v1, %v830_v15  ;;  %v345_v6 = vmul.f32 %v566_v1, %v838_v21 }
  0xe3   : > { %v340_v7 = vmul.f32 %v568_v2, %v821_v12  ;;  %v342_v8 = vmul.f32 %v568_v2, %v827_v14  ;;  %v344_v9 = vmul.f32 %v568_v2, %v833_v16  ;;  %v346_v10 = vmul.f32 %v568_v2, %v841_v22 }
  0xe4   : > { %347 = vst [vmem:[%s854_s30 + $0x40] sm:$0xff] %v339_v3  ;;  %349 = vst [vmem:[%s854_s30 + $0x50] sm:$0xff] %v341_v4 }
  0xe5   : > { %351 = vst [vmem:[%s854_s30 + $0x60] sm:$0xff] %v343_v5  ;;  %353 = vst [vmem:[%s854_s30 + $0x70] sm:$0xff] %v345_v6 }
  0xe6   : > { %348 = vst [vmem:[%s854_s30 + $0x48] sm:$0xff] %v340_v7  ;;  %350 = vst [vmem:[%s854_s30 + $0x58] sm:$0xff] %v342_v8 }
  0xe7   : > { %352 = vst [vmem:[%s854_s30 + $0x68] sm:$0xff] %v344_v9  ;;  %354 = vst [vmem:[%s854_s30 + $0x78] sm:$0xff] %v346_v10 }
  0xe8   : > { %610 = shalt.err (!%p607_p7)
}
  0xe9   : > { %s611_s18 = scalar_lea.hbm %s877_s7, 2048  ;;  %s615_s22 = scalar_lea.hbm %s942_s3, 4096 }
  0xea   : > { %p612_p10 = scmp.ne.s32.totalorder %s877_s7, %s611_s18  ;;  %p616_p2 = scmp.lt.s32.totalorder %s877_s7, %s942_s3 }
  0xeb   : > { %p617_p12 = scmp.lt.s32.totalorder %s615_s22, %s611_s18 }
  0xec   : > { %p613_p4 = pnand %p612_p10, %p757_p9 }
  0xed   : > { %p618_p8 = por %p617_p12, %p616_p2 }
  0xee   : > { %p614_p13 = pneg %p613_p4 }
  0xf0   : > { %p619_p0 = pnand %p618_p8, %p614_p13 }
  0xf2   : > { %622 = shalt.err (!%p619_p0)
}
  0xf3   : > { %s684_s30 = smov 256   ;;  %s685_s4 = smov 16  }
  0xf4   : > { %494 = dma.vmem_to_hbm [thread:$0]  (%p757_p9), %s879_s5, 2048, %s877_s7, %s356_s8, %s684_s30, %s684_s30, %s685_s4  }
  0xf5 PF: > { %s386_s6 = sand.u32 1, %s657_s12   ;;  %p948_p1 = scmp.ge.s32.totalorder %s677_s17, 2 }
  0xf6   : > { %s387_s15 = scalar_lea.sflag [#allocation4], %s386_s6 }
  0xf7   : > { %p501_p3 = pnand %p948_p1, %p764_p11 }
  0xf9   : > { %p502_p5 = pneg %p501_p3 }
  0xfb   : > { %652 = dma.done.wait (%p502_p5), %s387_s15, 2048  }
  0xfc   : > { %654 = vsyncadd (%p502_p5), %s387_s15, 4294965248  ;;  %s19_s17 = sadd.s32 1, %s677_s17   ;;  %s949_s12 = smov %s661_s13 }
  0xfd   : > { %p16_p6 = scmp.ge.s32.totalorder %s19_s17, 4   ;;  %s950_s13 = smov %s665_s14 }
  0xfe   : > { %s951_s14 = smov %s762_s26  ;;  %s952_s15 = smov %s673_s16 }
  0xff   : > { %s953_s16 = smov %s955_s20  ;;  %18 = sbr.rel (!%p16_p6) target bundleno = 6 (0x6), region = 80 }
 0x104   :  { %392 = vsyncpa [#allocation3], 1 }
 0x105   :  { %394 = vsyncpa [#allocation3 + $0x1], 1 }
 0x106   :  { %395 = vsyncpa [#allocation4], 1 }
 0x107   :  { %397 = vsyncpa [#allocation4 + $0x1], 1 }

</bundles_post_ra>
